<compile_context>
chip_gen: v7x
topology: tpu7x:2x2x1
jax: 0.10.0
libtpu: 0.0.40
codegen_flags: <defaults>
</compile_context>

<pallas_src>
import functools
import math

import jax
import jax.numpy as jnp
from jax.experimental import pallas as pl
from jax.experimental.pallas import tpu as pltpu


# ---------------------------------------------------------------------------
# Tiled linear:  y = x @ Wt + b   (bf16 MXU operands, f32 VMEM accumulator)
# Reduction axis is always grid axis 2.
# ---------------------------------------------------------------------------
def linear_kernel(x_ref, w_ref, b_ref, o_ref, acc_ref):
    @pl.when(pl.program_id(2) == 0)
    def _():
        acc_ref[...] = jnp.zeros_like(acc_ref)

    acc_ref[...] += jnp.dot(
        x_ref[...], w_ref[...], preferred_element_type=jnp.float32
    )

    @pl.when(pl.program_id(2) == pl.num_programs(2) - 1)
    def _():
        o_ref[...] = (acc_ref[...] + b_ref[...].astype(jnp.float32)).astype(o_ref.dtype)


def _fit_tile(dim, target, align):
    """Largest divisor of `dim` that is <= target and a multiple of `align`.
    If dim <= target, the full dim is used.  If no aligned divisor <= target exists,
    fall back to the full dim (always legal under the (8,128) BlockSpec rule) rather
    than a degenerate unaligned tile."""
    if dim <= target:
        return dim
    best_aligned = 0
    for t in range(1, target + 1):
        if dim % t == 0 and t % align == 0:
            best_aligned = t
    return best_aligned if best_aligned else dim


def pallas_linear(x, wt, b, *, out_dtype=jnp.float32,
                  tm_target=512, tn_target=512, tk_target=1024):
    """x: (M, K), wt: (K, N) pre-transposed bf16, b: (1, N) f32."""
    M, K = x.shape
    _, N = wt.shape
    x = x.astype(wt.dtype)  # bf16 MXU operands

    tm = _fit_tile(M, tm_target, 8)
    tn = _fit_tile(N, tn_target, 128)
    tk = _fit_tile(K, tk_target, 128)

    return pl.pallas_call(
        linear_kernel,
        out_shape=jax.ShapeDtypeStruct((M, N), out_dtype),
        grid=(M // tm, N // tn, K // tk),
        in_specs=[
            pl.BlockSpec((tm, tk), lambda i, j, k: (i, k)),
            pl.BlockSpec((tk, tn), lambda i, j, k: (k, j)),
            pl.BlockSpec((1, tn), lambda i, j, k: (0, j)),
        ],
        out_specs=pl.BlockSpec((tm, tn), lambda i, j, k: (i, j)),
        scratch_shapes=[pltpu.VMEM((tm, tn), jnp.float32)],
        compiler_params=pltpu.CompilerParams(
            dimension_semantics=("parallel", "parallel", "arbitrary")
        ),
    )(x, wt, b)


def pallas_qkv_linear(x, wt3, b3, *, out_dtype,
                      tm_target=512, tn_target=512, tk_target=1024):
    """Fused QKV projection.  x: (M, K); wt3: (3, K, N) stacked pre-transposed weights;
    b3: (3, 1, N).  Output is (3, M, N) so q/k/v feed pallas_attention directly
    (no jnp.split / reshape HBM round trip)."""
    M, K = x.shape
    _, _, N = wt3.shape
    x = x.astype(wt3.dtype)

    tm = _fit_tile(M, tm_target, 8)
    tn = _fit_tile(N, tn_target, 128)
    tk = _fit_tile(K, tk_target, 128)
    npd = N // tn  # output-lane blocks per q/k/v slab

    return pl.pallas_call(
        linear_kernel,
        out_shape=jax.ShapeDtypeStruct((3, M, N), out_dtype),
        grid=(M // tm, 3 * npd, K // tk),
        in_specs=[
            pl.BlockSpec((tm, tk), lambda i, j, k: (i, k)),
            pl.BlockSpec((None, tk, tn), lambda i, j, k: (j // npd, k, j % npd)),
            pl.BlockSpec((None, 1, tn), lambda i, j, k: (j // npd, 0, j % npd)),
        ],
        out_specs=pl.BlockSpec((None, tm, tn), lambda i, j, k: (j // npd, i, j % npd)),
        scratch_shapes=[pltpu.VMEM((tm, tn), jnp.float32)],
        compiler_params=pltpu.CompilerParams(
            dimension_semantics=("parallel", "parallel", "arbitrary")
        ),
    )(x, wt3, b3)


# ---------------------------------------------------------------------------
# Scaled dot-product attention.  One (batch, head-group, query-tile) per step.
# Activations stay in flat (…, S, D) layout; heads are lane slices in-kernel.
# ---------------------------------------------------------------------------
def attn_kernel(q_ref, k_ref, v_ref, ctx_ref, att_ref, *, heads_per_block, dim_k):
    hb, dk = heads_per_block, dim_k
    scale = 1.0 / math.sqrt(dk)

    # Fold 1/sqrt(dk) into the (tq, hb*dk) q tile once (cheap vs scaling the f32 scores).
    q = (q_ref[...] * jnp.float32(scale)).astype(q_ref.dtype)

    # Statically-unrolled per-head loop on lane slices: no (S, hb, dk) reshapes, no
    # head transposes; per-head ctx stores stay lane-contiguous.
    for h in range(hb):
        lo = h * dk
        q_h = q[:, lo:lo + dk]
        k_h = k_ref[:, lo:lo + dk]
        v_h = v_ref[:, lo:lo + dk]

        # (tq, S): contract dk of both operands — no materialized K^T.
        s = jax.lax.dot_general(
            q_h, k_h, (((1,), (1,)), ((), ())),
            preferred_element_type=jnp.float32,
        )

        # numerically-stable softmax along the key axis, f32 (matches F.softmax(dim=-1))
        s = s - jnp.max(s, axis=-1, keepdims=True)
        e = jnp.exp(s)
        # exact reciprocal over only tq row-sums so stored att rows sum to 1
        inv = 1.0 / jnp.sum(e, axis=-1, keepdims=True)
        p = e * inv

        att_ref[h] = p
        ctx_ref[:, lo:lo + dk] = jnp.dot(
            p.astype(v_h.dtype), v_h, preferred_element_type=jnp.float32
        ).astype(ctx_ref.dtype)


def _attn_tiles(num_heads, dim_k, seq_len, att_block_budget=2 * 1024 * 1024):
    """Pick (heads_per_block, query_tile).

    hb: smallest divisor of num_heads whose lane width hb*dk is a multiple of 128 (or
        the full model width D) — legal lane-dense blocks — and reaches min(128, D) lanes.
    tq: largest divisor of seq_len that is a multiple of 8 (or seq_len itself), <= 512,
        such that the *double-buffered* (hb, tq, S) f32 att output block stays within
        `att_block_budget` (keeps a 2-deep pipeline alive even on v7x's 64 MiB VMEM)."""
    D = num_heads * dim_k
    h_divs = [d for d in range(1, num_heads + 1) if num_heads % d == 0]
    legal_h = [d for d in h_divs if (d * dim_k) % 128 == 0 or d * dim_k == D]
    lane_target = min(128, D)
    hb = next((d for d in legal_h if d * dim_k >= lane_target), num_heads)

    q_divs = [d for d in range(1, seq_len + 1)
              if seq_len % d == 0 and (d % 8 == 0 or d == seq_len)]

    def att_bytes(h, t):
        return 2 * h * t * seq_len * 4  # double-buffered f32 att output block

    fitting = [d for d in q_divs if d <= 512 and att_bytes(hb, d) <= att_block_budget]
    tq = max(fitting) if fitting else min(q_divs)

    while att_bytes(hb, tq) > att_block_budget:
        smaller = [d for d in legal_h if d < hb]
        if not smaller:
            break
        hb = max(smaller)
    return hb, tq


def _attention_call(operands, in_specs, B, S, D, dtype, num_heads, hb, tq):
    dk = D // num_heads
    G = num_heads // hb
    hbd = hb * dk
    kern = functools.partial(attn_kernel, heads_per_block=hb, dim_k=dk)

    ctx_spec = pl.BlockSpec((None, tq, hbd), lambda b, g, qi: (b, qi, g))
    att_spec = pl.BlockSpec((None, hb, tq, S), lambda b, g, qi: (b, g, qi, 0))

    return pl.pallas_call(
        kern,
        out_shape=(
            jax.ShapeDtypeStruct((B, S, D), dtype),
            jax.ShapeDtypeStruct((B, num_heads, S, S), jnp.float32),
        ),
        grid=(B, G, S // tq),
        in_specs=list(in_specs),
        out_specs=(ctx_spec, att_spec),
        compiler_params=pltpu.CompilerParams(
            dimension_semantics=("parallel", "parallel", "parallel")
        ),
    )(*operands)


def pallas_attention(q, k, v, num_heads):
    """q, k, v: (B, S, D) -> (context (B,S,D), att_scores (B,H,S,S) f32)."""
    B, S, D = q.shape
    dk = D // num_heads
    hb, tq = _attn_tiles(num_heads, dk, S)
    hbd = hb * dk
    # K/V index_maps are independent of the query-tile index -> blocks stay VMEM-resident.
    q_spec = pl.BlockSpec((None, tq, hbd), lambda b, g, qi: (b, qi, g))
    kv_spec = pl.BlockSpec((None, S, hbd), lambda b, g, qi: (b, 0, g))
    return _attention_call((q, k, v), [q_spec, kv_spec, kv_spec],
                           B, S, D, q.dtype, num_heads, hb, tq)


def pallas_attention_fused(qkv, num_heads):
    """qkv: (3, B, S, D) from the fused QKV projection (index 0/1/2 = q/k/v)."""
    _, B, S, D = qkv.shape
    dk = D // num_heads
    hb, tq = _attn_tiles(num_heads, dk, S)
    hbd = hb * dk
    q_spec = pl.BlockSpec((None, None, tq, hbd), lambda b, g, qi: (0, b, qi, g))
    k_spec = pl.BlockSpec((None, None, S, hbd), lambda b, g, qi: (1, b, 0, g))
    v_spec = pl.BlockSpec((None, None, S, hbd), lambda b, g, qi: (2, b, 0, g))
    return _attention_call((qkv, qkv, qkv), [q_spec, k_spec, v_spec],
                           B, S, D, qkv.dtype, num_heads, hb, tq)


# ---------------------------------------------------------------------------
# MultiHeadAttention forward (inference)
# ---------------------------------------------------------------------------
def multi_head_attention(params, Q, K, V, num_heads, *, self_attention=None,
                         compute_dtype=jnp.bfloat16):
    """Q, K, V: (B, S, dim_model) f32.  Returns (output (B,S,D) f32, att (B,H,S,S) f32).
    Pass self_attention=True explicitly under jax.jit to take the fused-QKV path."""
    B, S, D = Q.shape
    assert D % num_heads == 0

    if self_attention is None:
        # object-identity fallback; only meaningful in eager mode
        self_attention = (Q is K) and (K is V)

    if self_attention:
        x = Q.reshape(B * S, D).astype(compute_dtype)
        qkv = pallas_qkv_linear(x, params["Wqkv_t"], params["Wqkv_b"],
                                out_dtype=compute_dtype)           # (3, B*S, D)
        qkv = qkv.reshape(3, B, S, D)                               # free view
        ctx, att_scores = pallas_attention_fused(qkv, num_heads)
    else:
        xq = Q.reshape(B * S, D).astype(compute_dtype)
        xk = K.reshape(B * S, D).astype(compute_dtype)
        xv = V.reshape(B * S, D).astype(compute_dtype)
        q = pallas_linear(xq, params["Wq_t"], params["Wq_b"],
                          out_dtype=compute_dtype).reshape(B, S, D)
        k = pallas_linear(xk, params["Wk_t"], params["Wk_b"],
                          out_dtype=compute_dtype).reshape(B, S, D)
        v = pallas_linear(xv, params["Wv_t"], params["Wv_b"],
                          out_dtype=compute_dtype).reshape(B, S, D)
        ctx, att_scores = pallas_attention(q, k, v, num_heads)

    # TODO(synk): nn.Dropout identity at inference; training-mode dropout not implemented.

    out = pallas_linear(
        ctx.reshape(B * S, D), params["Wo_t"], params["Wo_b"], out_dtype=jnp.float32
    ).reshape(B, S, D)
    return out, att_scores


# ---------------------------------------------------------------------------
# Parameters: PyTorch-style raw init + one-time kernel-friendly preparation
# ---------------------------------------------------------------------------
def init_params(key, dim_model):
    bound = 1.0 / math.sqrt(dim_model)
    names = ["Wq", "Wk", "Wv", "Wo"]
    params = {}
    keys = jax.random.split(key, 2 * len(names))
    for i, n in enumerate(names):
        params[f"{n}_w"] = jax.random.uniform(
            keys[2 * i], (dim_model, dim_model), jnp.float32, -bound, bound
        )
        params[f"{n}_b"] = jax.random.uniform(
            keys[2 * i + 1], (dim_model,), jnp.float32, -bound, bound
        )
    return params


def prepare_params(raw, compute_dtype=jnp.bfloat16):
    """Pre-transpose (and pre-stack QKV) weights once; biases stay f32."""
    p = {}
    for n in ["Wq", "Wk", "Wv", "Wo"]:
        p[f"{n}_t"] = raw[f"{n}_w"].T.astype(compute_dtype)            # (Din, Dout)
        p[f"{n}_b"] = raw[f"{n}_b"].reshape(1, -1).astype(jnp.float32)
    p["Wqkv_t"] = jnp.stack([p["Wq_t"], p["Wk_t"], p["Wv_t"]], axis=0)  # (3, Din, Dout)
    p["Wqkv_b"] = jnp.stack([p["Wq_b"], p["Wk_b"], p["Wv_b"]], axis=0)  # (3, 1, Dout)
    return p


# ---------------------------------------------------------------------------
# Pure-JAX f32 reference (mirrors the PyTorch module) for correctness checks
# ---------------------------------------------------------------------------
def reference_mha(raw, Q, K, V, num_heads):
    B, S, D = Q.shape
    dk = D // num_heads

    def lin(x, w, b):
        return x @ w.T + b

    def split(x):
        return jnp.transpose(x.reshape(B, S, num_heads, dk), (0, 2, 1, 3))

    q = split(lin(Q, raw["Wq_w"], raw["Wq_b"]))
    k = split(lin(K, raw["Wk_w"], raw["Wk_b"]))
    v = split(lin(V, raw["Wv_w"], raw["Wv_b"]))
    s = jnp.einsum("bhqd,bhkd->bhqk", q, k) / math.sqrt(dk)
    att = jax.nn.softmax(s, axis=-1)
    ctx = jnp.einsum("bhqk,bhkd->bhqd", att, v)
    ctx = jnp.transpose(ctx, (0, 2, 1, 3)).reshape(B, S, D)
    out = lin(ctx, raw["Wo_w"], raw["Wo_b"])
    return out, att


if __name__ == "__main__":
    B, S, D, H = 2, 8, 32, 4

    root = jax.random.PRNGKey(0)
    kp, kq, kk, kv = jax.random.split(root, 4)
    raw = init_params(kp, D)
    params = prepare_params(raw)

    Q = jax.random.normal(kq, (B, S, D), jnp.float32)
    K = jax.random.normal(kk, (B, S, D), jnp.float32)
    V = jax.random.normal(kv, (B, S, D), jnp.float32)

    # --- general (cross-attention) path ---
    out, att = multi_head_attention(params, Q, K, V, num_heads=H)
    out = jax.block_until_ready(out)
    att = jax.block_until_ready(att)
    ref_out, ref_att = reference_mha(raw, Q, K, V, H)

    assert out.shape == (B, S, D)
    assert att.shape == (B, H, S, S)
    assert jnp.allclose(jnp.sum(att, axis=-1), 1.0, atol=1e-3)
    assert jnp.allclose(att, ref_att, atol=4e-2, rtol=5e-2)
    assert jnp.allclose(out, ref_out, atol=1e-1, rtol=1e-1)

    # --- fused self-attention path (explicit flag, jit-safe) ---
    out_s, att_s = multi_head_attention(params, Q, Q, Q, num_heads=H,
                                        self_attention=True)
    out_s = jax.block_until_ready(out_s)
    att_s = jax.block_until_ready(att_s)
    ref_out_s, ref_att_s = reference_mha(raw, Q, Q, Q, H)

    assert jnp.allclose(jnp.sum(att_s, axis=-1), 1.0, atol=1e-3)
    assert jnp.allclose(att_s, ref_att_s, atol=4e-2, rtol=5e-2)
    assert jnp.allclose(out_s, ref_out_s, atol=1e-1, rtol=1e-1)

    print("KERNEL_OK")
</pallas_src>

<mosaic_0001>
module attributes {stable_mosaic.version = 11 : i64} {
  func.func @linear_kernel(%arg0: i32, %arg1: i32, %arg2: i32, %arg3: memref<16x32xbf16, #tpu.memory_space<vmem>>, %arg4: memref<32x32xbf16, #tpu.memory_space<vmem>>, %arg5: memref<1x32xf32, #tpu.memory_space<vmem>>, %arg6: memref<16x32xbf16, #tpu.memory_space<vmem>>, %arg7: memref<16x32xf32, #tpu.memory_space<vmem>>) attributes {dimension_semantics = [#tpu.dimension_semantics<parallel>, #tpu.dimension_semantics<parallel>, #tpu.dimension_semantics<arbitrary>], iteration_bounds = array<i64: 1, 1, 1>, scalar_prefetch = 0 : i64, scratch_operands = 1 : i64, tpu.core_type = #tpu.core_type<tc>, window_params = [{transform_indices = @transform_0, window_bounds = array<i64: 16, 32>}, {transform_indices = @transform_1, window_bounds = array<i64: 32, 32>}, {transform_indices = @transform_2, window_bounds = array<i64: 1, 32>}, {transform_indices = @transform_3, window_bounds = array<i64: 16, 32>}]} {
    %c0_i32 = arith.constant 0 : i32
    %0 = arith.cmpi eq, %arg2, %c0_i32 : i32
    %1 = arith.extui %0 : i1 to i32
    %c0_i32_0 = arith.constant 0 : i32
    %2 = arith.cmpi ne, %1, %c0_i32_0 : i32
    scf.if %2 {
      %cst_10 = arith.constant 0.000000e+00 : f32
      %12 = vector.broadcast %cst_10 : f32 to vector<16x32xf32>
      %c0_11 = arith.constant 0 : index
      %c0_12 = arith.constant 0 : index
      %13 = vector.load %arg7[%c0_11, %c0_12] : memref<16x32xf32, #tpu.memory_space<vmem>>, vector<16x32xf32>
      tpu.vector_store %arg7[%c0_11, %c0_12], %12 {strides = array<i32>} : memref<16x32xf32, #tpu.memory_space<vmem>>, vector<16x32xf32>,
    } else {
    }
    %c0 = arith.constant 0 : index
    %c0_1 = arith.constant 0 : index
    %3 = vector.load %arg7[%c0, %c0_1] : memref<16x32xf32, #tpu.memory_space<vmem>>, vector<16x32xf32>
    %c0_2 = arith.constant 0 : index
    %c0_3 = arith.constant 0 : index
    %4 = vector.load %arg3[%c0_2, %c0_3] : memref<16x32xbf16, #tpu.memory_space<vmem>>, vector<16x32xbf16>
    %c0_4 = arith.constant 0 : index
    %c0_5 = arith.constant 0 : index
    %5 = vector.load %arg4[%c0_4, %c0_5] : memref<32x32xbf16, #tpu.memory_space<vmem>>, vector<32x32xbf16>
    %cst = arith.constant dense<0.000000e+00> : vector<16x32xf32>
    %6 = tpu.matmul %4, %5, %cst {dimension_numbers = #tpu.dot_dimension_numbers<[1], [0], [0], [1], [0, 0, 1, 1], [], []>} : vector<16x32xbf16>, vector<32x32xbf16>, vector<16x32xf32> -> vector<16x32xf32>
    %7 = arith.addf %3, %6 : vector<16x32xf32>
    %c0_6 = arith.constant 0 : index
    %c0_7 = arith.constant 0 : index
    %8 = vector.load %arg7[%c0_6, %c0_7] : memref<16x32xf32, #tpu.memory_space<vmem>>, vector<16x32xf32>
    tpu.vector_store %arg7[%c0_6, %c0_7], %7 {strides = array<i32>} : memref<16x32xf32, #tpu.memory_space<vmem>>, vector<16x32xf32>,
    %c0_i32_8 = arith.constant 0 : i32
    %9 = arith.cmpi eq, %arg2, %c0_i32_8 : i32
    %10 = arith.extui %9 : i1 to i32
    %c0_i32_9 = arith.constant 0 : i32
    %11 = arith.cmpi ne, %10, %c0_i32_9 : i32
    scf.if %11 {
      %c0_10 = arith.constant 0 : index
      %c0_11 = arith.constant 0 : index
      %12 = vector.load %arg7[%c0_10, %c0_11] : memref<16x32xf32, #tpu.memory_space<vmem>>, vector<16x32xf32>
      %c0_12 = arith.constant 0 : index
      %c0_13 = arith.constant 0 : index
      %13 = vector.load %arg5[%c0_12, %c0_13] : memref<1x32xf32, #tpu.memory_space<vmem>>, vector<1x32xf32>
      %14 = vector.broadcast %13 : vector<1x32xf32> to vector<16x32xf32>
      %15 = arith.addf %12, %14 : vector<16x32xf32>
      %16 = arith.truncf %15 : vector<16x32xf32> to vector<16x32xbf16>
      %c0_14 = arith.constant 0 : index
      %c0_15 = arith.constant 0 : index
      %17 = vector.load %arg6[%c0_14, %c0_15] : memref<16x32xbf16, #tpu.memory_space<vmem>>, vector<16x32xbf16>
      tpu.vector_store %arg6[%c0_14, %c0_15], %16 {strides = array<i32>} : memref<16x32xbf16, #tpu.memory_space<vmem>>, vector<16x32xbf16>,
    } else {
    }
    return
  }
  func.func @transform_0(%arg0: i32, %arg1: i32, %arg2: i32) -> (i32, i32) {
    %c0_i32 = arith.constant 0 : i32
    return %arg0, %arg2 : i32, i32
  }
  func.func @transform_1(%arg0: i32, %arg1: i32, %arg2: i32) -> (i32, i32) {
    %c0_i32 = arith.constant 0 : i32
    return %arg2, %arg1 : i32, i32
  }
  func.func @transform_2(%arg0: i32, %arg1: i32, %arg2: i32) -> (i32, i32) {
    %c0_i32 = arith.constant 0 : i32
    %c0_i32_0 = arith.constant 0 : i32
    return %c0_i32, %arg1 : i32, i32
  }
  func.func @transform_3(%arg0: i32, %arg1: i32, %arg2: i32) -> (i32, i32) {
    %c0_i32 = arith.constant 0 : i32
    return %arg0, %arg1 : i32, i32
  }
}

</mosaic_0001>

<bundles_post_ra>
// kernel: tpu_custom_call.1
= control target key start
LH: loop header
LB: loop body
LE: loop exit
PB: predicated region body
PF: predicated region fallthrough
CT: control target
= control target key end

     0   :  { %8 = vsyncpa [#allocation4], 0  ;;  %s350_s0 = inlined_call_operand.hbm [shape: bf16[16,32], index: 0, kind: input, shape index: {}]   ;;  %s351_s1 = inlined_call_operand.hbm [shape: bf16[32,32], index: 1, kind: input, shape index: {}]   ;;  %s352_s2 = inlined_call_operand.vmem [shape: f32[1,32], index: 2, kind: input, shape index: {}]   ;;  %s353_s3 = inlined_call_operand.hbm [shape: bf16[16,32], index: 3, kind: output, shape index: {}]  }
   0x1   :  { %9 = vsyncpa [#allocation7], 0 }
   0x2   :  { %10 = vsyncpa [#allocation5], 0  ;;  %s270_s12 = smov [#allocation3]   ;;  %s198_s16 = scalar_lea.hbm %s350_s0, 128 }
   0x3   :  { %s16_s13 = sshll.u32 %s270_s12, 4  ;;  %p199_p0 = scmp.ne.s32.totalorder %s350_s0, %s198_s16  ;;  %s17_s13 = int_to_ptr.vmem [resolvable:$true] %s16_s13 }
   0x4   :  { %p202_p1 = scmp.lt.u32.totalorder %s198_s16, %s350_s0 }
   0x6   :  { %p204_p2 = pnand %p202_p1, %p199_p0 }
   0x8   :  { %207 = shalt.err (!%p204_p2)
}
   0x9   :  { %s208_s21 = scalar_lea.vmem %s17_s13, 128  ;;  %p213_p4 = scmp.lt.s32.totalorder %s17_s13, %s17_s13 }
   0xa   :  { %p209_p3 = scmp.ne.s32.totalorder %s17_s13, %s208_s21  ;;  %p214_p5 = scmp.lt.s32.totalorder %s208_s21, %s208_s21 }
   0xc   :  { %p215_p6 = por %p214_p5, %p213_p4 }
   0xe   :  { %p216_p7 = pnand %p215_p6, %p209_p3 }
  0x10   :  { %219 = shalt.err (!%p216_p7)
}
  0x11   :  { %s271_s22 = smov 64   ;;  %s272_s23 = smov 4  }
  0x12   :  { %22 = dma.hbm_to_vmem [thread:$0]  %s350_s0, 128, %s17_s13, [#allocation4], %s271_s22, %s271_s22, %s272_s23  }
  0x13   :  { %s273_s26 = smov [#allocation6]   ;;  %s220_s30 = scalar_lea.hbm %s351_s1, 256 }
  0x14   :  { %s28_s27 = sshll.u32 %s273_s26, 4  ;;  %p221_p8 = scmp.ne.s32.totalorder %s351_s1, %s220_s30  ;;  %s29_s27 = int_to_ptr.vmem [resolvable:$true] %s28_s27 }
  0x15   :  { %p224_p9 = scmp.lt.u32.totalorder %s220_s30, %s351_s1 }
  0x17   :  { %p226_p10 = pnand %p224_p9, %p221_p8 }
  0x19   :  { %229 = shalt.err (!%p226_p10)
}
  0x1a   :  { %s230_s8 = scalar_lea.vmem %s29_s27, 256  ;;  %p235_p12 = scmp.lt.s32.totalorder %s29_s27, %s29_s27 }
  0x1b   :  { %p231_p11 = scmp.ne.s32.totalorder %s29_s27, %s230_s8  ;;  %p236_p13 = scmp.lt.s32.totalorder %s230_s8, %s230_s8 }
  0x1d   :  { %p237_p0 = por %p236_p13, %p235_p12 }
  0x1f   :  { %p238_p1 = pnand %p237_p0, %p231_p11 }
  0x21   :  { %241 = shalt.err (!%p238_p1)
}
  0x22   :  { %34 = dma.hbm_to_vmem [thread:$0]  %s351_s1, 256, %s29_s27, [#allocation7], %s271_s22, %s271_s22, %s272_s23  }
  0x23   :  { %264 = dma.done.wait [#allocation4], 128  }
  0x24   :  { %265 = vsyncadd [#allocation4], 4294967168 }
  0x25   :  { %266 = dma.done.wait [#allocation7], 256  }
  0x26   :  { %267 = vsyncadd [#allocation7], 4294967040  ;;  %vm48_vm0 = vcmask 261120   ;;  %v274_v0 = vmov 0.0   ;;  %vm275_vm1 = vmmov 0   ;;  %v195_v1 = vld [vmem:[#allocation6] sm:$0xff]  }
  0x27   :  { %180 = vmatprep.subr.bf16.mxu0 %v274_v0  ;;  %184 = vmatprep.mubr.msk.bf16.mxu0 %vm275_vm1, %v274_v0  ;;  %49 = vst.msk [vmem:[#allocation2] sm:$0xff] %vm48_vm0, %v274_v0  ;;  %50 = vst.msk [vmem:[#allocation2 + $0x8] sm:$0xff] %vm48_vm0, %v274_v0  ;;  %v196_v2 = vld [vmem:[#allocation6 + $0x8] sm:$0xff]   ;;  %v197_v3 = vld [vmem:[#allocation3] sm:$0xff]   ;;  %vm147_vm2 = vcmask 257024   ;;  %s276_s11 = smov [#allocation8]  }
  0x28   :  { %181 = vmatpush3.bf16.msra.mxu0 %v195_v1  ;;  %v172_v12 = vld [vmem:[%s352_s2] ss:$0 sm:$0xff]  ;;  %s155_s12 = sshll.u32 %s276_s11, 4  ;;  %s156_s12 = int_to_ptr.vmem [resolvable:$true] %s155_s12 }
  0x29   :  { %182 = vmatprep.subr.bf16.mxu0 %v274_v0  ;;  %s242_s13 = scalar_lea.vmem %s156_s12, 128  ;;  %p247_p3 = scmp.lt.s32.totalorder %s156_s12, %s156_s12 }
  0x2a   :  { %p243_p2 = scmp.ne.s32.totalorder %s156_s12, %s242_s13  ;;  %p248_p4 = scmp.lt.s32.totalorder %s242_s13, %s242_s13 }
  0x2c   :  { %183 = vmatpush3.bf16.msra.mxu0 %v196_v2  ;;  %p249_p5 = por %p248_p4, %p247_p3 }
  0x2e   :  { %v51_v4 = vld [vmem:[#allocation2] sm:$0xff]  ;;  %v52_v6 = vld [vmem:[#allocation2 + $0x8] sm:$0xff]  ;;  %p250_p6 = pnand %p249_p5, %p243_p2 }
  0x2f   :  { %185 = vmatmul.mubr.msk.bf16.vlgmr.msra.gmra.mrb[0].mxu0 %vm48_vm0, %v197_v3 }
 0x102   :  { %v114_v5 = vpop.f32.mrb[0].mxu0 }
 0x103   :  { %v121_v7 = vadd.f32 %v114_v5, %v51_v4  ;;  %v186_v8 = vpop.f32.mrb[1].mxu0 }
 0x104   :  { %v117_v9 = vpop.f32.mrb[2].mxu0 }
 0x105   :  { %123 = vst.msk [vmem:[#allocation2] sm:$0xff] %vm48_vm0, %v121_v7  ;;  %v122_v10 = vadd.f32 %v117_v9, %v52_v6  ;;  %v187_v11 = vpop.f32.mrb[3].mxu0 }
 0x107   :  { %124 = vst.msk [vmem:[#allocation2 + $0x8] sm:$0xff] %vm48_vm0, %v122_v10 }
 0x10c   :  { %v128_v13 = vld [vmem:[#allocation2] sm:$0xff] }
 0x10d   :  { %v137_v14 = vadd.f32 %v172_v12, %v128_v13 }
 0x10e   :  { %v129_v15 = vld [vmem:[#allocation2 + $0x8] sm:$0xff] }
 0x10f   :  { %v138_v16 = vadd.f32 %v172_v12, %v129_v15  ;;  %v175_v17 = vpack.c.bf16 %v137_v14, %v137_v14 }
 0x111   :  { %v176_v18 = vpack.c.bf16 %v138_v16, %v138_v16  ;;  %148 = vst.msk [vmem:[#allocation8] sm:$0xf] %vm147_vm2, %v175_v17 }
 0x113   :  { %149 = vst.msk [vmem:[#allocation8 + $0x4] sm:$0xf] %vm147_vm2, %v176_v18 }
 0x114   :  { %253 = shalt.err (!%p250_p6)
}
 0x115   :  { %s254_s15 = scalar_lea.hbm %s353_s3, 128 }
 0x116   :  { %p255_p7 = scmp.ne.s32.totalorder %s353_s3, %s254_s15  ;;  %p258_p8 = scmp.lt.u32.totalorder %s254_s15, %s353_s3 }
 0x118   :  { %p260_p9 = pnand %p258_p8, %p255_p7 }
 0x11a   :  { %263 = shalt.err (!%p260_p9)
}
 0x11b   :  { %161 = dma.vmem_to_hbm [thread:$0]  %s156_s12, 128, %s353_s3, [#allocation5], %s271_s22, %s271_s22, %s272_s23  }
 0x11c   :  { %268 = dma.done.wait [#allocation5], 128  }
 0x11d   :  { %269 = vsyncadd [#allocation5], 4294967168 }
 0x11e   :  { %165 = vsyncpa [#allocation4], 1 }
 0x11f   :  { %166 = vsyncpa [#allocation7], 1 }
 0x120   :  { %167 = vsyncpa [#allocation5], 1 }

</bundles_post_ra>
